<compile_context>
chip_gen: v5e
topology: v5e:2x2
jax: 0.10.0
libtpu: 0.0.40
codegen_flags: <defaults>
</compile_context>

<pallas_src>
import functools

import jax
import jax.numpy as jnp
from jax.experimental import pallas as pl
from jax.experimental.pallas import tpu as pltpu

HIDDEN_SIZE = 128
INPUT_SIZE = 28
OUTPUT_SIZE = 10
LANE = 128
NEG_INF = -1e30  # bias for padded logit lanes: exp() underflows to exactly 0


def _round_up(n, m):
    return ((n + m - 1) // m) * m


# ----------------------------------------------------------------------------
# one-time parameter preparation (hoisted out of the per-call path)
# ----------------------------------------------------------------------------
def prep_params(params, input_size=INPUT_SIZE):
    """Fuse i2h / i2o weights into a single [K, hid + out_pad] slab.

    PyTorch Linear weight is [out, in]; split along "in" into the x part and the
    h part, transpose to [in, out], concatenate i2h|i2o along the output axis and
    pad the i2o columns to a multiple of 128 lanes.  Padded bias entries are set
    to -1e30 so padded logits never contribute to the log-softmax.
    """
    w_i2h, b_i2h, w_i2o, b_i2o = params
    hid = w_i2h.shape[0]
    out = w_i2o.shape[0]
    out_pad = _round_up(out, LANE)

    def pad_cols(w):  # [rows, out] -> [rows, out_pad]
        return jnp.pad(w, ((0, 0), (0, out_pad - out)))

    wx = jnp.concatenate([w_i2h[:, :input_size].T,            # [in, hid]
                          pad_cols(w_i2o[:, :input_size].T)],  # [in, out_pad]
                         axis=1)                               # [in, hid+out_pad]
    wh = jnp.concatenate([w_i2h[:, input_size:].T,             # [hid, hid]
                          pad_cols(w_i2o[:, input_size:].T)],  # [hid, out_pad]
                         axis=1)                               # [hid, hid+out_pad]
    b = jnp.concatenate(
        [b_i2h, jnp.pad(b_i2o, (0, out_pad - out), constant_values=NEG_INF)]
    ).reshape(1, hid + out_pad)
    return wx, wh, b, hid, out, out_pad


# ----------------------------------------------------------------------------
# single-step kernel (matches RNN.forward exactly)
# ----------------------------------------------------------------------------
def _rnn_cell_kernel(x_ref, h_ref, wx_ref, wh_ref, b_ref,
                     logp_ref, newh_ref, *, hid):
    x = x_ref[...].astype(jnp.float32)
    h = h_ref[...].astype(jnp.float32)
    # Fused matmul: cols [0:hid] = i2h new hidden, cols [hid:] = padded i2o logits.
    acc = (jnp.dot(x, wx_ref[...], preferred_element_type=jnp.float32)
           + jnp.dot(h, wh_ref[...], preferred_element_type=jnp.float32)
           + b_ref[...])
    new_h = acc[:, :hid]
    logits = acc[:, hid:]                    # padded lanes are -1e30 via the bias
    # numerically stable LogSoftmax(dim=1)
    m = jnp.max(logits, axis=1, keepdims=True)
    shifted = logits - m
    lse = jnp.log(jnp.sum(jnp.exp(shifted), axis=1, keepdims=True))
    logp_ref[...] = (shifted - lse).astype(logp_ref.dtype)   # lane-dense [B, out_pad]
    newh_ref[...] = new_h.astype(newh_ref.dtype)


def rnn_forward(x, h, prepped):
    """One RNN step: returns (log_softmax [B, out], new_hidden [B, hid])."""
    wx, wh, b, hid, out, out_pad = prepped
    B = x.shape[0]
    vmem = pl.BlockSpec(memory_space=pltpu.MemorySpace.VMEM)
    logp_pad, new_h = pl.pallas_call(
        functools.partial(_rnn_cell_kernel, hid=hid),
        out_shape=(jax.ShapeDtypeStruct((B, out_pad), jnp.float32),
                   jax.ShapeDtypeStruct((B, hid), jnp.float32)),
        in_specs=[vmem] * 5,
        out_specs=(vmem, vmem),
    )(x, h, wx, wh, b)
    return logp_pad[:, :out], new_h


# ----------------------------------------------------------------------------
# sequence-fused kernel: whole recurrence in ONE pallas_call
# (weights resident in VMEM, hidden state carried in VMEM scratch)
# ----------------------------------------------------------------------------
def _rnn_seq_kernel(x_ref, h0_ref, wx_ref, wh_ref, b_ref,
                    logp_ref, hT_ref, h_scratch, *, hid):
    @pl.when(pl.program_id(0) == 0)
    def _():
        h_scratch[...] = h0_ref[...].astype(jnp.float32)

    x = x_ref[0].astype(jnp.float32)         # block (1, B, in) -> [B, in]
    h = h_scratch[...]
    acc = (jnp.dot(x, wx_ref[...], preferred_element_type=jnp.float32)
           + jnp.dot(h, wh_ref[...], preferred_element_type=jnp.float32)
           + b_ref[...])
    new_h = acc[:, :hid]
    logits = acc[:, hid:]
    m = jnp.max(logits, axis=1, keepdims=True)
    shifted = logits - m
    lse = jnp.log(jnp.sum(jnp.exp(shifted), axis=1, keepdims=True))
    logp_ref[0] = (shifted - lse).astype(logp_ref.dtype)
    h_scratch[...] = new_h                   # carry hidden to next grid step
    hT_ref[...] = new_h.astype(hT_ref.dtype)


def rnn_sequence_forward(x_seq, h0, prepped):
    """Run T RNN steps in a single pallas_call (timestep axis = "arbitrary")."""
    wx, wh, b, hid, out, out_pad = prepped
    T, B, in_sz = x_seq.shape
    npad = hid + out_pad
    grid_spec = pltpu.PrefetchScalarGridSpec(
        num_scalar_prefetch=0,
        grid=(T,),
        in_specs=[
            pl.BlockSpec((1, B, in_sz), lambda t: (t, 0, 0)),   # x[t]
            pl.BlockSpec((B, hid), lambda t: (0, 0)),           # h0 (resident)
            pl.BlockSpec((in_sz, npad), lambda t: (0, 0)),      # fused Wx (resident)
            pl.BlockSpec((hid, npad), lambda t: (0, 0)),        # fused Wh (resident)
            pl.BlockSpec((1, npad), lambda t: (0, 0)),          # fused bias (resident)
        ],
        out_specs=(
            pl.BlockSpec((1, B, out_pad), lambda t: (t, 0, 0)),  # log-probs per step
            pl.BlockSpec((B, hid), lambda t: (0, 0)),            # final hidden
        ),
        scratch_shapes=[pltpu.VMEM((B, hid), jnp.float32)],
    )
    logp_pad, h_T = pl.pallas_call(
        functools.partial(_rnn_seq_kernel, hid=hid),
        out_shape=(jax.ShapeDtypeStruct((T, B, out_pad), jnp.float32),
                   jax.ShapeDtypeStruct((B, hid), jnp.float32)),
        grid_spec=grid_spec,
        compiler_params=pltpu.CompilerParams(dimension_semantics=("arbitrary",)),
    )(x_seq, h0, wx, wh, b)
    return logp_pad[:, :, :out], h_T


# ----------------------------------------------------------------------------
# init / test
# ----------------------------------------------------------------------------
def init_params(key, input_size, hidden_size, output_size):
    """Deterministic init mimicking nn.Linear's uniform(-1/sqrt(fan_in), 1/sqrt(fan_in))."""
    k1, k2, k3, k4 = jax.random.split(key, 4)
    fan_in = input_size + hidden_size
    bound = 1.0 / jnp.sqrt(fan_in)
    w_i2h = jax.random.uniform(k1, (hidden_size, fan_in), jnp.float32, -bound, bound)
    b_i2h = jax.random.uniform(k2, (hidden_size,), jnp.float32, -bound, bound)
    w_i2o = jax.random.uniform(k3, (output_size, fan_in), jnp.float32, -bound, bound)
    b_i2o = jax.random.uniform(k4, (output_size,), jnp.float32, -bound, bound)
    return (w_i2h, b_i2h, w_i2o, b_i2o)


if __name__ == "__main__":
    key = jax.random.PRNGKey(0)
    kx, kh, kp, ks = jax.random.split(key, 4)

    B, T = 2, 8
    x = jax.random.normal(kx, (B, INPUT_SIZE), jnp.float32)
    h = jax.random.normal(kh, (B, HIDDEN_SIZE), jnp.float32)
    params = init_params(kp, INPUT_SIZE, HIDDEN_SIZE, OUTPUT_SIZE)
    prepped = prep_params(params, INPUT_SIZE)      # one-time weight fusion/transpose

    # --- single-step forward (the module's forward) ------------------------
    log_probs, new_hidden = jax.block_until_ready(rnn_forward(x, h, prepped))

    w_i2h, b_i2h, w_i2o, b_i2o = params
    combined = jnp.concatenate([x, h], axis=1)
    ref_hidden = combined @ w_i2h.T + b_i2h
    ref_logp = jax.nn.log_softmax(combined @ w_i2o.T + b_i2o, axis=1)
    assert log_probs.shape == (B, OUTPUT_SIZE) and new_hidden.shape == (B, HIDDEN_SIZE)
    assert jnp.allclose(log_probs, ref_logp, atol=1e-5), "log-softmax mismatch"
    assert jnp.allclose(new_hidden, ref_hidden, atol=1e-5), "hidden mismatch"

    # --- sequence-fused forward (one pallas_call for all T steps) ----------
    x_seq = jax.random.normal(ks, (T, B, INPUT_SIZE), jnp.float32)
    logp_seq, h_T = jax.block_until_ready(rnn_sequence_forward(x_seq, h, prepped))

    h_ref = h
    for t in range(T):
        c = jnp.concatenate([x_seq[t], h_ref], axis=1)
        lp_ref = jax.nn.log_softmax(c @ w_i2o.T + b_i2o, axis=1)
        assert jnp.allclose(logp_seq[t], lp_ref, atol=1e-4), f"seq log-softmax mismatch at t={t}"
        h_ref = c @ w_i2h.T + b_i2h
    assert jnp.allclose(h_T, h_ref, atol=1e-4), "seq hidden mismatch"

    print("KERNEL_OK")
</pallas_src>

<mosaic_0001>
module attributes {stable_mosaic.version = 11 : i64} {
  func.func @_rnn_cell_kernel(%arg0: memref<2x28xf32, #tpu.memory_space<vmem>>, %arg1: memref<2x128xf32, #tpu.memory_space<vmem>>, %arg2: memref<28x256xf32, #tpu.memory_space<vmem>>, %arg3: memref<128x256xf32, #tpu.memory_space<vmem>>, %arg4: memref<1x256xf32, #tpu.memory_space<vmem>>, %arg5: memref<2x128xf32, #tpu.memory_space<vmem>>, %arg6: memref<2x128xf32, #tpu.memory_space<vmem>>) attributes {dimension_semantics = [], scalar_prefetch = 0 : i64, scratch_operands = 0 : i64, tpu.core_type = #tpu.core_type<tc>} {
    %c0 = arith.constant 0 : index
    %c0_0 = arith.constant 0 : index
    %0 = vector.load %arg0[%c0, %c0_0] : memref<2x28xf32, #tpu.memory_space<vmem>>, vector<2x28xf32>
    %c0_1 = arith.constant 0 : index
    %c0_2 = arith.constant 0 : index
    %1 = vector.load %arg1[%c0_1, %c0_2] : memref<2x128xf32, #tpu.memory_space<vmem>>, vector<2x128xf32>
    %c0_3 = arith.constant 0 : index
    %c0_4 = arith.constant 0 : index
    %2 = vector.load %arg2[%c0_3, %c0_4] : memref<28x256xf32, #tpu.memory_space<vmem>>, vector<28x256xf32>
    %cst = arith.constant dense<0.000000e+00> : vector<2x256xf32>
    %3 = tpu.matmul %0, %2, %cst {dimension_numbers = #tpu.dot_dimension_numbers<[1], [0], [0], [1], [0, 0, 1, 1], [], []>} : vector<2x28xf32>, vector<28x256xf32>, vector<2x256xf32> -> vector<2x256xf32>
    %c0_5 = arith.constant 0 : index
    %c0_6 = arith.constant 0 : index
    %4 = vector.load %arg3[%c0_5, %c0_6] : memref<128x256xf32, #tpu.memory_space<vmem>>, vector<128x256xf32>
    %cst_7 = arith.constant dense<0.000000e+00> : vector<2x256xf32>
    %5 = tpu.matmul %1, %4, %cst_7 {dimension_numbers = #tpu.dot_dimension_numbers<[1], [0], [0], [1], [0, 0, 1, 1], [], []>} : vector<2x128xf32>, vector<128x256xf32>, vector<2x256xf32> -> vector<2x256xf32>
    %6 = arith.addf %3, %5 : vector<2x256xf32>
    %c0_8 = arith.constant 0 : index
    %c0_9 = arith.constant 0 : index
    %7 = vector.load %arg4[%c0_8, %c0_9] : memref<1x256xf32, #tpu.memory_space<vmem>>, vector<1x256xf32>
    %8 = vector.broadcast %7 : vector<1x256xf32> to vector<2x256xf32>
    %9 = arith.addf %6, %8 : vector<2x256xf32>
    %10 = vector.extract_strided_slice %9 {offsets = [0, 0], sizes = [2, 128], strides = [1, 1]} : vector<2x256xf32> to vector<2x128xf32>
    %11 = vector.extract_strided_slice %9 {offsets = [0, 128], sizes = [2, 128], strides = [1, 1]} : vector<2x256xf32> to vector<2x128xf32>
    %cst_10 = arith.constant dense<0xFF800000> : vector<2xf32>
    %12 = vector.multi_reduction <maximumf>, %11, %cst_10 [1] : vector<2x128xf32> to vector<2xf32>
    %13 = vector.shape_cast %12 : vector<2xf32> to vector<2x1xf32>
    %14 = vector.broadcast %13 : vector<2x1xf32> to vector<2x128xf32>
    %15 = arith.subf %11, %14 : vector<2x128xf32>
    %16 = math.exp %15 : vector<2x128xf32>
    %cst_11 = arith.constant dense<0.000000e+00> : vector<2xf32>
    %17 = vector.multi_reduction <add>, %16, %cst_11 [1] : vector<2x128xf32> to vector<2xf32>
    %18 = vector.shape_cast %17 : vector<2xf32> to vector<2x1xf32>
    %19 = math.log %18 : vector<2x1xf32>
    %20 = vector.broadcast %19 : vector<2x1xf32> to vector<2x128xf32>
    %21 = arith.subf %15, %20 : vector<2x128xf32>
    %c0_12 = arith.constant 0 : index
    %c0_13 = arith.constant 0 : index
    %22 = vector.load %arg5[%c0_12, %c0_13] : memref<2x128xf32, #tpu.memory_space<vmem>>, vector<2x128xf32>
    tpu.vector_store %arg5[%c0_12, %c0_13], %21 {strides = array<i32>} : memref<2x128xf32, #tpu.memory_space<vmem>>, vector<2x128xf32>,
    %c0_14 = arith.constant 0 : index
    %c0_15 = arith.constant 0 : index
    %23 = vector.load %arg6[%c0_14, %c0_15] : memref<2x128xf32, #tpu.memory_space<vmem>>, vector<2x128xf32>
    tpu.vector_store %arg6[%c0_14, %c0_15], %10 {strides = array<i32>} : memref<2x128xf32, #tpu.memory_space<vmem>>, vector<2x128xf32>,
    return
  }
}

</mosaic_0001>

<bundles_post_ra>
// kernel: tpu_custom_call.1
= control target key start
LH: loop header
LB: loop body
LE: loop exit
PB: predicated region body
PF: predicated region fallthrough
CT: control target
= control target key end

     0   :  { %12 = vsyncpa [#allocation3], 0  ;;  %s518_s0 = inlined_call_operand.hbm [shape: f32[2,28], index: 0, kind: input, shape index: {}]   ;;  %s519_s1 = inlined_call_operand.hbm [shape: f32[2,128], index: 1, kind: input, shape index: {}]   ;;  %s520_s2 = inlined_call_operand.hbm [shape: f32[28,256], index: 2, kind: input, shape index: {}]   ;;  %s521_s3 = inlined_call_operand.hbm [shape: f32[128,256], index: 3, kind: input, shape index: {}]   ;;  %s522_s4 = inlined_call_operand.vmem [shape: f32[1,256], index: 4, kind: input, shape index: {}]   ;;  %s523_s5 = inlined_call_operand.hbm [shape: f32[2,128], index: 5, kind: output, shape index: {0}]   ;;  %s524_s6 = inlined_call_operand.hbm [shape: f32[2,128], index: 6, kind: output, shape index: {1}]  }
   0x1   :  { %13 = vsyncpa [#allocation6], 0 }
   0x2   :  { %14 = vsyncpa [#allocation9], 0 }
   0x3   :  { %15 = vsyncpa [#allocation4], 0  ;;  %s33_s23 = sshll.u32 %s519_s1, 4  ;;  %s34_s23 = int_to_ptr.hbm [resolvable:$true] %s33_s23 }
   0x4   :  { %16 = vsyncpa [#allocation12], 0  ;;  %s444_s24 = smov [#allocation5]   ;;  %s22_s28 = sshll.u32 %s518_s0, 4  ;;  %s23_s28 = int_to_ptr.hbm [resolvable:$true] %s22_s28 }
   0x5   :  { %s35_s25 = sshll.u32 %s444_s24, 4  ;;  %s445_s29 = smov [#allocation2]   ;;  %s36_s25 = int_to_ptr.vmem [resolvable:$true] %s35_s25 }
   0x6   :  { %38 = dma.hbm_to_vmem [thread:$0]  %s34_s23, 32, %s36_s25, [#allocation6]  }
   0x7   :  { %s24_s30 = sshll.u32 %s445_s29, 4  ;;  %s43_s9 = sshll.u32 %s520_s2, 4  ;;  %s25_s30 = int_to_ptr.vmem [resolvable:$true] %s24_s30  ;;  %s44_s9 = int_to_ptr.hbm [resolvable:$true] %s43_s9 }
   0x8   :  { %27 = dma.hbm_to_vmem [thread:$0]  %s23_s28, 32, %s25_s30, [#allocation3]  }
   0x9   :  { %s446_s1 = smov [#allocation7]   ;;  %s56_s13 = sshll.u32 %s521_s3, 4  ;;  %s57_s13 = int_to_ptr.hbm [resolvable:$true] %s56_s13 }
   0xa   :  { %s45_s10 = sshll.u32 %s446_s1, 4  ;;  %s447_s14 = smov 256   ;;  %s46_s10 = int_to_ptr.vmem [resolvable:$true] %s45_s10 }
   0xb   :  { %s448_s0 = smov 16   ;;  %s449_s15 = smov [#allocation8]  }
   0xc   :  { %51 = dma.hbm_to_vmem [thread:$0]  %s44_s9, 1024, %s46_s10, [#allocation6], %s447_s14, %s447_s14, %s448_s0  }
   0xd   :  { %s58_s16 = sshll.u32 %s449_s15, 4  ;;  %s59_s16 = int_to_ptr.vmem [resolvable:$true] %s58_s16 }
   0xe   :  { %64 = dma.hbm_to_vmem [thread:$0]  %s57_s13, 4096, %s59_s16, [#allocation9], %s447_s14, %s447_s14, %s448_s0  }
   0xf   :  { %434 = dma.done.wait [#allocation3], 32  }
  0x10   :  { %435 = vsyncadd [#allocation3], 4294967264 }
  0x11   :  { %436 = dma.done.wait [#allocation6], 1056  }
  0x12   :  { %437 = vsyncadd [#allocation6], 4294966240 }
  0x13   :  { %438 = dma.done.wait [#allocation9], 4096  }
  0x14   :  { %439 = vsyncadd [#allocation9], 4294963200  ;;  %v124_v0 = vld [vmem:[#allocation8 + $0xf8] sm:$0xff]  ;;  %v122_v1 = vld [vmem:[#allocation8 + $0xe8] sm:$0xff]  ;;  %vm169_vm0 = vcmask 1043456   ;;  %vm165_vm1 = vcmask 228352  }
  0x15   :  { %145 = vmatpush.msra.mxu1 %v124_v0  ;;  %v120_v2 = vld [vmem:[#allocation8 + $0xd8] sm:$0xff]  ;;  %v118_v4 = vld [vmem:[#allocation8 + $0xc8] sm:$0xff]  ;;  %v123_v22 = vld [vmem:[#allocation8 + $0xf0] sm:$0xff]  ;;  %vm224_vm2 = vcmask 1041408   ;;  %s257_s20 = sshll.u32 %s524_s6, 4  ;;  %s451_s21 = smov [#allocation10]   ;;  %s258_s20 = int_to_ptr.hbm [resolvable:$true] %s257_s20 }
  0x16   :  { %v92_v3 = vld [vmem:[#allocation7 + $0x38] sm:$0xf]  ;;  %v90_v5 = vld [vmem:[#allocation7 + $0x28] sm:$0xff]  ;;  %v500_v10 = vld [vmem:[#allocation2] sm:$0x3]  ;;  %125 = vmatpush.msra.mxu0 %v123_v22  ;;  %s244_s22 = sshll.u32 %s451_s21, 4  ;;  %s245_s22 = int_to_ptr.vmem [resolvable:$true] %s244_s22 }
  0x17   :  { %146 = vmatpush.msra.mxu1 %v122_v1  ;;  %276 = vmatpush.msk.msra.mxu3 %vm169_vm0, %v92_v3  ;;  %v88_v6 = vld [vmem:[#allocation7 + $0x18] sm:$0xff]  ;;  %v86_v8 = vld [vmem:[#allocation7 + $0x8] sm:$0xff]  ;;  %v121_v23 = vld [vmem:[#allocation8 + $0xe0] sm:$0xff]  ;;  %s246_s25 = sshll.u32 %s523_s5, 4  ;;  %s247_s25 = int_to_ptr.hbm [resolvable:$true] %s246_s25 }
  0x18   :  { %v116_v7 = vld [vmem:[#allocation8 + $0xb8] sm:$0xff]  ;;  %v114_v9 = vld [vmem:[#allocation8 + $0xa8] sm:$0xff]  ;;  %v119_v24 = vld [vmem:[#allocation8 + $0xd0] sm:$0xff]  ;;  %126 = vmatpush.msra.mxu0 %v121_v23 }
  0x19   :  { %147 = vmatpush.msra.mxu1 %v120_v2  ;;  %209 = vmatpush.msra.mxu3 %v90_v5  ;;  %v112_v11 = vld [vmem:[#allocation8 + $0x98] sm:$0xff]  ;;  %v110_v12 = vld [vmem:[#allocation8 + $0x88] sm:$0xff]  ;;  %v91_v25 = vld [vmem:[#allocation7 + $0x30] sm:$0xf] }
  0x1a   :  { %v108_v13 = vld [vmem:[#allocation8 + $0x78] sm:$0xff]  ;;  %v106_v14 = vld [vmem:[#allocation8 + $0x68] sm:$0xff]  ;;  %v117_v26 = vld [vmem:[#allocation8 + $0xc0] sm:$0xff]  ;;  %274 = vmatpush.msk.msra.mxu2 %vm169_vm0, %v91_v25  ;;  %127 = vmatpush.msra.mxu0 %v119_v24 }
  0x1b   :  { %148 = vmatpush.msra.mxu1 %v118_v4  ;;  %210 = vmatpush.msra.mxu3 %v88_v6  ;;  %v104_v15 = vld [vmem:[#allocation8 + $0x58] sm:$0xff]  ;;  %v102_v16 = vld [vmem:[#allocation8 + $0x48] sm:$0xff]  ;;  %v89_v27 = vld [vmem:[#allocation7 + $0x20] sm:$0xff] }
  0x1c   :  { %v100_v17 = vld [vmem:[#allocation8 + $0x38] sm:$0xff]  ;;  %v98_v18 = vld [vmem:[#allocation8 + $0x28] sm:$0xff]  ;;  %v115_v28 = vld [vmem:[#allocation8 + $0xb0] sm:$0xff]  ;;  %189 = vmatpush.msra.mxu2 %v89_v27  ;;  %128 = vmatpush.msra.mxu0 %v117_v26 }
  0x1d   :  { %149 = vmatpush.msra.mxu1 %v116_v7  ;;  %211 = vmatpush.msra.mxu3 %v86_v8  ;;  %v96_v19 = vld [vmem:[#allocation8 + $0x18] sm:$0xff]  ;;  %v94_v20 = vld [vmem:[#allocation8 + $0x8] sm:$0xff]  ;;  %v113_v29 = vld [vmem:[#allocation8 + $0xa0] sm:$0xff] }
  0x1e   :  { %277 = vmatmul.msk.f32.vlgmr.msra.gmra.mxu3 %vm165_vm1, %v500_v10  ;;  %v84_v21 = vld [vmem:[#allocation5] sm:$0x3]  ;;  %129 = vmatpush.msra.mxu0 %v115_v28  ;;  %v111_v30 = vld [vmem:[#allocation8 + $0x90] sm:$0xff]  ;;  %v109_v31 = vld [vmem:[#allocation8 + $0x80] sm:$0xff] }
  0x1f   :  { %150 = vmatpush.msra.mxu1 %v114_v9  ;;  %v107_v32 = vld [vmem:[#allocation8 + $0x70] sm:$0xff]  ;;  %v105_v33 = vld [vmem:[#allocation8 + $0x60] sm:$0xff]  ;;  %v216_v35 = vld [vmem:[%s522_s4] sm:$0x3]  ;;  %s450_s4 = smov [#allocation11]  }
  0x20   :  { %130 = vmatpush.msra.mxu0 %v113_v29  ;;  %v103_v34 = vld [vmem:[#allocation8 + $0x50] sm:$0xff]  ;;  %v219_v37 = vperm.slane %v216_v35, 1  ;;  %v101_v42 = vld [vmem:[#allocation8 + $0x40] sm:$0xff]  ;;  %s255_s17 = sshll.u32 %s450_s4, 4  ;;  %v218_v57 = vperm.slane %v216_v35, 0  ;;  %s256_s17 = int_to_ptr.vmem [resolvable:$true] %s255_s17 }
  0x21   :  { %151 = vmatpush.msra.mxu1 %v112_v11  ;;  %v87_v43 = vld [vmem:[#allocation7 + $0x10] sm:$0xff]  ;;  %v85_v45 = vld [vmem:[#allocation7] sm:$0xff] }
  0x22   :  { %131 = vmatpush.msra.mxu0 %v111_v30  ;;  %190 = vmatpush.msra.mxu2 %v87_v43  ;;  %v99_v44 = vld [vmem:[#allocation8 + $0x30] sm:$0xff]  ;;  %v97_v46 = vld [vmem:[#allocation8 + $0x20] sm:$0xff] }
  0x23   :  { %152 = vmatpush.msra.mxu1 %v110_v12  ;;  %v95_v47 = vld [vmem:[#allocation8 + $0x10] sm:$0xff]  ;;  %v93_v48 = vld [vmem:[#allocation8] sm:$0xff] }
  0x24   :  { %132 = vmatpush.msra.mxu0 %v109_v31  ;;  %191 = vmatpush.msra.mxu2 %v85_v45 }
  0x25   :  { %153 = vmatpush.msra.mxu1 %v108_v13  ;;  %275 = vmatmul.msk.f32.vlgmr.msra.gmra.mxu2 %vm165_vm1, %v500_v10 }
  0x26   :  { %133 = vmatpush.msra.mxu0 %v107_v32 }
  0x27   :  { %154 = vmatpush.msra.mxu1 %v106_v14 }
  0x28   :  { %134 = vmatpush.msra.mxu0 %v105_v33 }
  0x29   :  { %155 = vmatpush.msra.mxu1 %v104_v15 }
  0x2a   :  { %135 = vmatpush.msra.mxu0 %v103_v34 }
  0x2b   :  { %156 = vmatpush.msra.mxu1 %v102_v16 }
  0x2c   :  { %136 = vmatpush.msra.mxu0 %v101_v42 }
  0x2d   :  { %157 = vmatpush.msra.mxu1 %v100_v17 }
  0x2e   :  { %137 = vmatpush.msra.mxu0 %v99_v44 }
  0x2f   :  { %158 = vmatpush.msra.mxu1 %v98_v18 }
  0x30   :  { %138 = vmatpush.msra.mxu0 %v97_v46 }
  0x31   :  { %159 = vmatpush.msra.mxu1 %v96_v19 }
  0x32   :  { %139 = vmatpush.msra.mxu0 %v95_v47 }
  0x33   :  { %160 = vmatpush.msra.mxu1 %v94_v20 }
  0x34   :  { %161 = vmatmul.f32.vlgmr.msra.gmra.mxu1 %v84_v21  ;;  %140 = vmatpush.msra.mxu0 %v93_v48 }
  0x35   :  { %141 = vmatmul.f32.vlgmr.msra.gmra.mxu0 %v84_v21 }
  0xa1   :  { %v213_v36 = vpop.f32.mrf.mxu3 }
  0xa8   :  { %v193_v55 = vpop.f32.mrf.mxu2 }
  0xb1   :  { %v162_v38 = vpop.f32.mrf.mxu1 }
  0xb2   :  { %v214_v39 = vadd.f32 %v213_v36, %v162_v38  ;;  %v142_v54 = vpop.f32.mrf.mxu0 }
  0xb3   :  { %v194_v56 = vadd.f32 %v193_v55, %v142_v54 }
  0xb4   :  { %v223_v40 = vadd.f32 %v219_v37, %v214_v39 }
  0xb5   :  { %v222_v58 = vadd.f32 %v218_v57, %v194_v56 }
  0xb6   :  { %v225_v41 = vsel %vm224_vm2, %v223_v40, -inf }
  0xb7   :  { %226 = vmax.xlane.f32.xlu0 %v225_v41  ;;  %238 = vst [vmem:[#allocation11] sm:$0x3] %v222_v58 }
  0xb8   :  { %260 = dma.vmem_to_hbm [thread:$0]  %s256_s17, 32, %s258_s20, [#allocation12]  }
 0x12a   :  { %v227_v49 = vpop.xlane.xlu0 %226 }
 0x12b   :  { %v228_v50 = vsub.f32 %v223_v40, %v227_v49 }
 0x12d   :  { %v229_v51 = vmul.f32 1.442695, %v228_v50 }
 0x12f   :  { %286 = vpow2.f32 %v229_v51 }
 0x135   :  { %v287_v52 = vpop.eup %286 }
 0x136   :  { %v231_v53 = vsel %vm224_vm2, %v287_v52, 0.0 }
 0x137   :  { %232 = vadd.xlane.f32.xlu0 %v231_v53 }
 0x1aa   :  { %v233_v59 = vpop.xlane.xlu0 %232 }
 0x1ab   :  { %288 = vlog2.f32 %v233_v59 }
 0x1b1   :  { %v289_v60 = vpop.eup %288 }
 0x1b2   :  { %v235_v61 = vmul.f32 0.6931472, %v289_v60 }
 0x1b4   :  { %v236_v62 = vsub.f32 %v228_v50, %v235_v61 }
 0x1b6   :  { %237 = vst [vmem:[#allocation10] sm:$0x3] %v236_v62 }
 0x1b7   :  { %249 = dma.vmem_to_hbm [thread:$0]  %s245_s22, 32, %s247_s25, [#allocation4]  }
 0x1b8   :  { %440 = dma.done.wait [#allocation4], 32  }
 0x1b9   :  { %441 = vsyncadd [#allocation4], 4294967264 }
 0x1ba   :  { %442 = dma.done.wait [#allocation12], 32  }
 0x1bb   :  { %443 = vsyncadd [#allocation12], 4294967264 }
 0x1bc   :  { %269 = vsyncpa [#allocation3], 1 }
 0x1bd   :  { %270 = vsyncpa [#allocation6], 1 }
 0x1be   :  { %271 = vsyncpa [#allocation9], 1 }
 0x1bf   :  { %272 = vsyncpa [#allocation4], 1 }
 0x1c0   :  { %273 = vsyncpa [#allocation12], 1 }

</bundles_post_ra>
